<compile_context>
chip_gen: v7x
topology: tpu7x:2x2x1
jax: 0.10.0
libtpu: 0.0.40
codegen_flags: <defaults>
</compile_context>

<pallas_src>
import jax
import jax.numpy as jnp
from jax.experimental import pallas as pl
from jax.experimental.pallas import tpu as pltpu

_LANE = 128
_SUBLANE = 8


def _round_up(x, m):
    return ((x + m - 1) // m) * m


def time_embedding_kernel(t_ref, w1_ref, b1_ref, w2_ref, b2_ref, out_ref):
    # t_ref : (TB, 128) f32, timestep value broadcast across the lane axis
    # w1_ref: (1, Epad) f32     b1_ref: (1, Epad) f32
    # w2_ref: (Epad, Epad) bf16 (MXU dtype)
    # b2_ref: (1, Epad) f32     out_ref: (TB, Epad) f32
    t = t_ref[...]
    w1 = w1_ref[...]

    # Linear(1, E): a (B,1)@(1,E) matmul is just a broadcasted multiply -> keep
    # it on the VPU in f32 (no MXU waste; v5e has no bf16 VPU, so stay f32).
    if w1.shape[-1] == t.shape[-1]:
        h = t * w1 + b1_ref[...]            # pure lane-aligned VPU multiply
    else:
        h = t[:, 0:1] * w1 + b1_ref[...]    # Epad > 128: single lane-broadcast
    h = jnp.maximum(h, 0.0)                 # ReLU (f32)

    # Linear(E, E): real matmul -> MXU, bf16 inputs, f32 accumulation.
    o = jnp.dot(h.astype(w2_ref.dtype), w2_ref[...],
                preferred_element_type=jnp.float32)
    o = o + b2_ref[...]
    out_ref[...] = jnp.maximum(o, 0.0).astype(out_ref.dtype)   # ReLU


def time_embedding(t, w1, b1, w2, b2, *, mxu_dtype=jnp.bfloat16, tb_max=256):
    """t: any shape (flattened like t.view(-1, 1)); w1:(1,E) b1:(E,) w2:(E,E) b2:(E,)."""
    f32 = jnp.float32
    t_flat = jnp.reshape(t, (-1,)).astype(f32)
    B = t_flat.shape[0]
    E = w1.shape[-1]

    Epad = _round_up(E, _LANE)
    TB = min(tb_max, _round_up(B, _SUBLANE))
    Bpad = _round_up(B, TB)
    grid_b = Bpad // TB

    # Lane-dense t: (Bpad, 128) with the value broadcast across lanes (tiny
    # traffic; avoids the degenerate (B,1) strided DMA and, when Epad == 128,
    # any in-kernel cross-lane broadcast).
    t_pad = jnp.zeros((Bpad,), f32).at[:B].set(t_flat)
    t_lane = jnp.broadcast_to(t_pad[:, None], (Bpad, _LANE))

    # Zero-pad params to lane-aligned Epad; padded rows/cols contribute zeros.
    w1p = jnp.zeros((1, Epad), f32).at[:, :E].set(jnp.reshape(w1, (1, E)).astype(f32))
    b1p = jnp.zeros((1, Epad), f32).at[:, :E].set(jnp.reshape(b1, (1, E)).astype(f32))
    b2p = jnp.zeros((1, Epad), f32).at[:, :E].set(jnp.reshape(b2, (1, E)).astype(f32))
    w2p = jnp.zeros((Epad, Epad), f32).at[:E, :E].set(w2.astype(f32)).astype(mxu_dtype)

    itemsize = jnp.dtype(mxu_dtype).itemsize
    cost = pl.CostEstimate(
        flops=2 * Bpad * Epad * Epad + 4 * Bpad * Epad,
        transcendentals=0,
        bytes_accessed=(4 * (Bpad * _LANE + Bpad * Epad + 3 * Epad)
                        + itemsize * Epad * Epad),
    )

    # Double-buffered worst-case VMEM footprint.  Only raise the scoped limit
    # when needed (matters on v7x: 64 MiB physical / 32 MiB scoped default).
    vmem_est = (2 * TB * _LANE * 4 + 2 * TB * Epad * 4
                + 2 * Epad * Epad * itemsize + 6 * Epad * 4)
    vmem_limit = None
    if vmem_est > 24 * 1024 * 1024:
        vmem_limit = min(2 * vmem_est, 96 * 1024 * 1024)
    # For very large E on v7x, additionally single-buffer the resident W2 block
    # (pipeline_mode=pl.Buffered(1)) or tile the second matmul's N/K dims.

    out_pad = pl.pallas_call(
        time_embedding_kernel,
        out_shape=jax.ShapeDtypeStruct((Bpad, Epad), f32),
        grid=(grid_b,),
        in_specs=[
            pl.BlockSpec((TB, _LANE), lambda i: (i, 0)),    # t     (per B-tile)
            pl.BlockSpec((1, Epad), lambda i: (0, 0)),      # W1    (resident)
            pl.BlockSpec((1, Epad), lambda i: (0, 0)),      # b1    (resident)
            pl.BlockSpec((Epad, Epad), lambda i: (0, 0)),   # W2    (resident)
            pl.BlockSpec((1, Epad), lambda i: (0, 0)),      # b2    (resident)
        ],
        out_specs=pl.BlockSpec((TB, Epad), lambda i: (i, 0)),
        compiler_params=pltpu.CompilerParams(
            dimension_semantics=("parallel",),
            vmem_limit_bytes=vmem_limit),
        cost_estimate=cost,
    )(t_lane, w1p, b1p, w2p, b2p)

    return out_pad[:B, :E]


def init_params(key, embed_dim):
    """Deterministic init mimicking PyTorch nn.Linear default (uniform +-1/sqrt(fan_in))."""
    k1, k2, k3, k4 = jax.random.split(key, 4)
    bound1 = 1.0 / jnp.sqrt(1.0)          # fan_in = 1
    bound2 = 1.0 / jnp.sqrt(embed_dim)    # fan_in = embed_dim
    w1 = jax.random.uniform(k1, (1, embed_dim), jnp.float32, -bound1, bound1)
    b1 = jax.random.uniform(k2, (embed_dim,), jnp.float32, -bound1, bound1)
    w2 = jax.random.uniform(k3, (embed_dim, embed_dim), jnp.float32, -bound2, bound2)
    b2 = jax.random.uniform(k4, (embed_dim,), jnp.float32, -bound2, bound2)
    return w1, b1, w2, b2


def time_embedding_ref(t, w1, b1, w2, b2, mxu_dtype=jnp.float32):
    """Pure-JAX reference mirroring the kernel's MXU dtype (bf16 in, f32 acc)."""
    t2 = jnp.reshape(t, (-1, 1)).astype(jnp.float32)
    h = jnp.maximum(t2 * w1 + b1, 0.0)
    h2 = h.astype(mxu_dtype).astype(jnp.float32)
    w2c = w2.astype(mxu_dtype).astype(jnp.float32)
    return jnp.maximum(h2 @ w2c + b2, 0.0)


if __name__ == "__main__":
    key = jax.random.PRNGKey(0)
    k_t, k_p = jax.random.split(key)

    batch = 8
    embed_dim = 32

    # "timesteps" — a flat vector of B scalars (forward views it to (B, 1)).
    t = jax.random.uniform(k_t, (batch,), jnp.float32, 0.0, 1000.0)
    w1, b1, w2, b2 = init_params(k_p, embed_dim)

    out = time_embedding(t, w1, b1, w2, b2)
    out = jax.block_until_ready(out)

    # Reference with the same bf16-input / f32-accumulate matmul semantics as
    # the kernel (pure-f32 PyTorch semantics differ only at bf16 mantissa level).
    ref = time_embedding_ref(t, w1, b1, w2, b2, mxu_dtype=jnp.bfloat16)
    assert out.shape == (batch, embed_dim), out.shape
    assert jnp.allclose(out, ref, atol=1e-2, rtol=1e-3), "mismatch vs reference"

    print("KERNEL_OK")
</pallas_src>

<mosaic_0001>
module attributes {stable_mosaic.version = 11 : i64} {
  func.func @time_embedding_kernel(%arg0: i32, %arg1: memref<8x128xf32, #tpu.memory_space<vmem>>, %arg2: memref<1x128xf32, #tpu.memory_space<vmem>>, %arg3: memref<1x128xf32, #tpu.memory_space<vmem>>, %arg4: memref<128x128xbf16, #tpu.memory_space<vmem>>, %arg5: memref<1x128xf32, #tpu.memory_space<vmem>>, %arg6: memref<8x128xf32, #tpu.memory_space<vmem>>) attributes {dimension_semantics = [#tpu.dimension_semantics<parallel>], iteration_bounds = array<i64: 1>, scalar_prefetch = 0 : i64, scratch_operands = 0 : i64, tpu.core_type = #tpu.core_type<tc>, window_params = [{transform_indices = @transform_0, window_bounds = array<i64: 8, 128>}, {pipeline_mode = #tpu.pipeline_mode<synchronous>, transform_indices = @transform_1, window_bounds = array<i64: 1, 128>}, {pipeline_mode = #tpu.pipeline_mode<synchronous>, transform_indices = @transform_2, window_bounds = array<i64: 1, 128>}, {pipeline_mode = #tpu.pipeline_mode<synchronous>, transform_indices = @transform_3, window_bounds = array<i64: 128, 128>}, {pipeline_mode = #tpu.pipeline_mode<synchronous>, transform_indices = @transform_4, window_bounds = array<i64: 1, 128>}, {transform_indices = @transform_5, window_bounds = array<i64: 8, 128>}]} {
    %c0 = arith.constant 0 : index
    %c0_0 = arith.constant 0 : index
    %0 = vector.load %arg1[%c0, %c0_0] : memref<8x128xf32, #tpu.memory_space<vmem>>, vector<8x128xf32>
    %c0_1 = arith.constant 0 : index
    %c0_2 = arith.constant 0 : index
    %1 = vector.load %arg2[%c0_1, %c0_2] : memref<1x128xf32, #tpu.memory_space<vmem>>, vector<1x128xf32>
    %2 = vector.broadcast %1 : vector<1x128xf32> to vector<8x128xf32>
    %3 = arith.mulf %0, %2 : vector<8x128xf32>
    %c0_3 = arith.constant 0 : index
    %c0_4 = arith.constant 0 : index
    %4 = vector.load %arg3[%c0_3, %c0_4] : memref<1x128xf32, #tpu.memory_space<vmem>>, vector<1x128xf32>
    %5 = vector.broadcast %4 : vector<1x128xf32> to vector<8x128xf32>
    %6 = arith.addf %3, %5 : vector<8x128xf32>
    %cst = arith.constant 0.000000e+00 : f32
    %7 = vector.broadcast %cst : f32 to vector<8x128xf32>
    %8 = arith.maximumf %6, %7 : vector<8x128xf32>
    %9 = arith.truncf %8 : vector<8x128xf32> to vector<8x128xbf16>
    %c0_5 = arith.constant 0 : index
    %c0_6 = arith.constant 0 : index
    %10 = vector.load %arg4[%c0_5, %c0_6] : memref<128x128xbf16, #tpu.memory_space<vmem>>, vector<128x128xbf16>
    %cst_7 = arith.constant dense<0.000000e+00> : vector<8x128xf32>
    %11 = tpu.matmul %9, %10, %cst_7 {dimension_numbers = #tpu.dot_dimension_numbers<[1], [0], [0], [1], [0, 0, 1, 1], [], []>} : vector<8x128xbf16>, vector<128x128xbf16>, vector<8x128xf32> -> vector<8x128xf32>
    %c0_8 = arith.constant 0 : index
    %c0_9 = arith.constant 0 : index
    %12 = vector.load %arg5[%c0_8, %c0_9] : memref<1x128xf32, #tpu.memory_space<vmem>>, vector<1x128xf32>
    %13 = vector.broadcast %12 : vector<1x128xf32> to vector<8x128xf32>
    %14 = arith.addf %11, %13 : vector<8x128xf32>
    %cst_10 = arith.constant 0.000000e+00 : f32
    %15 = vector.broadcast %cst_10 : f32 to vector<8x128xf32>
    %16 = arith.maximumf %14, %15 : vector<8x128xf32>
    %c0_11 = arith.constant 0 : index
    %c0_12 = arith.constant 0 : index
    %17 = vector.load %arg6[%c0_11, %c0_12] : memref<8x128xf32, #tpu.memory_space<vmem>>, vector<8x128xf32>
    tpu.vector_store %arg6[%c0_11, %c0_12], %16 {strides = array<i32>} : memref<8x128xf32, #tpu.memory_space<vmem>>, vector<8x128xf32>,
    return
  }
  func.func @transform_0(%arg0: i32) -> (i32, i32) {
    %c0_i32 = arith.constant 0 : i32
    %c0_i32_0 = arith.constant 0 : i32
    return %arg0, %c0_i32 : i32, i32
  }
  func.func @transform_1(%arg0: i32) -> (i32, i32) {
    %c0_i32 = arith.constant 0 : i32
    %c0_i32_0 = arith.constant 0 : i32
    %c0_i32_1 = arith.constant 0 : i32
    return %c0_i32, %c0_i32_0 : i32, i32
  }
  func.func @transform_2(%arg0: i32) -> (i32, i32) {
    %c0_i32 = arith.constant 0 : i32
    %c0_i32_0 = arith.constant 0 : i32
    %c0_i32_1 = arith.constant 0 : i32
    return %c0_i32, %c0_i32_0 : i32, i32
  }
  func.func @transform_3(%arg0: i32) -> (i32, i32) {
    %c0_i32 = arith.constant 0 : i32
    %c0_i32_0 = arith.constant 0 : i32
    %c0_i32_1 = arith.constant 0 : i32
    return %c0_i32, %c0_i32_0 : i32, i32
  }
  func.func @transform_4(%arg0: i32) -> (i32, i32) {
    %c0_i32 = arith.constant 0 : i32
    %c0_i32_0 = arith.constant 0 : i32
    %c0_i32_1 = arith.constant 0 : i32
    return %c0_i32, %c0_i32_0 : i32, i32
  }
  func.func @transform_5(%arg0: i32) -> (i32, i32) {
    %c0_i32 = arith.constant 0 : i32
    %c0_i32_0 = arith.constant 0 : i32
    return %arg0, %c0_i32 : i32, i32
  }
}

</mosaic_0001>

<bundles_post_ra>
// kernel: tpu_custom_call.1
= control target key start
LH: loop header
LB: loop body
LE: loop exit
PB: predicated region body
PF: predicated region fallthrough
CT: control target
= control target key end

     0   :  { %10 = vsyncpa [#allocation3], 0  ;;  %s412_s0 = inlined_call_operand.hbm [shape: f32[8,128], index: 0, kind: input, shape index: {}]   ;;  %s413_s1 = inlined_call_operand.vmem [shape: f32[1,128], index: 1, kind: input, shape index: {}]   ;;  %s414_s2 = inlined_call_operand.vmem [shape: f32[1,128], index: 2, kind: input, shape index: {}]   ;;  %s415_s3 = inlined_call_operand.hbm [shape: bf16[128,128], index: 3, kind: input, shape index: {}]   ;;  %s416_s4 = inlined_call_operand.vmem [shape: f32[1,128], index: 4, kind: input, shape index: {}]   ;;  %s417_s5 = inlined_call_operand.hbm [shape: f32[8,128], index: 5, kind: output, shape index: {}]  }
   0x1   :  { %11 = vsyncpa [#allocation6], 0 }
   0x2   :  { %12 = vsyncpa [#allocation4], 0  ;;  %s323_s18 = smov [#allocation2]   ;;  %s324_s20 = smov [#allocation5]  }
   0x3   :  { %s19_s19 = sshll.u32 %s323_s18, 4  ;;  %s32_s21 = sshll.u32 %s324_s20, 4  ;;  %s20_s19 = int_to_ptr.vmem [resolvable:$true] %s19_s19  ;;  %s360_s21 = int_to_ptr.vmem [resolvable:$true] %s32_s21 }
   0x4   :  { %s251_s24 = scalar_lea.hbm %s412_s0, 128 }
   0x5   :  { %p252_p0 = scmp.ne.s32.totalorder %s412_s0, %s251_s24  ;;  %p255_p1 = scmp.lt.u32.totalorder %s251_s24, %s412_s0 }
   0x7   :  { %p257_p2 = pnand %p255_p1, %p252_p0 }
   0x9   :  { %260 = shalt.err (!%p257_p2)
}
   0xa   :  { %s261_s29 = scalar_lea.vmem %s20_s19, 128  ;;  %p266_p4 = scmp.lt.s32.totalorder %s20_s19, %s20_s19 }
   0xb   :  { %p262_p3 = scmp.ne.s32.totalorder %s20_s19, %s261_s29  ;;  %p267_p5 = scmp.lt.s32.totalorder %s261_s29, %s261_s29 }
   0xd   :  { %p268_p6 = por %p267_p5, %p266_p4 }
   0xf   :  { %p269_p7 = pnand %p268_p6, %p262_p3 }
  0x11   :  { %272 = shalt.err (!%p269_p7)
}
  0x12   :  { %22 = dma.hbm_to_vmem [thread:$0]  %s412_s0, 128, %s20_s19, [#allocation3]  }
  0x13   :  { %s273_s9 = scalar_lea.hbm %s415_s3, 1024 }
  0x14   :  { %p274_p8 = scmp.ne.s32.totalorder %s415_s3, %s273_s9  ;;  %p277_p9 = scmp.lt.u32.totalorder %s273_s9, %s415_s3 }
  0x16   :  { %p279_p10 = pnand %p277_p9, %p274_p8 }
  0x18   :  { %282 = shalt.err (!%p279_p10)
}
  0x19   :  { %s283_s14 = scalar_lea.vmem %s360_s21, 1024  ;;  %p288_p12 = scmp.lt.s32.totalorder %s360_s21, %s360_s21 }
  0x1a   :  { %p284_p11 = scmp.ne.s32.totalorder %s360_s21, %s283_s14  ;;  %p289_p13 = scmp.lt.s32.totalorder %s283_s14, %s283_s14 }
  0x1c   :  { %p290_p0 = por %p289_p13, %p288_p12 }
  0x1e   :  { %p291_p1 = pnand %p290_p0, %p284_p11 }
  0x20   :  { %294 = shalt.err (!%p291_p1)
}
  0x21   :  { %s325_s0 = smov 64   ;;  %s326_s15 = smov 4  }
  0x22   :  { %38 = dma.hbm_to_vmem [thread:$0]  %s415_s3, 1024, %s360_s21, [#allocation6], %s325_s0, %s325_s0, %s326_s15  }
  0x23   :  { %317 = dma.done.wait [#allocation3], 128  }
  0x24   :  { %318 = vsyncadd [#allocation3], 4294967168 }
  0x25   :  { %319 = dma.done.wait [#allocation6], 1024  }
  0x26   :  { %320 = vsyncadd [#allocation6], 4294966272  ;;  %v327_v0 = vmov 0.0   ;;  %vm328_vm0 = vmmov 0   ;;  %v243_v1 = vld [vmem:[#allocation5] sm:$0xff]   ;;  %v244_v2 = vld [vmem:[#allocation5 + $0x8] sm:$0xff]  }
  0x27   :  { %216 = vmatprep.subr.bf16.mxu0 %v327_v0  ;;  %232 = vmatprep.mubr.msk.bf16.mxu0 %vm328_vm0, %v327_v0  ;;  %v245_v3 = vld [vmem:[#allocation5 + $0x10] sm:$0xff]   ;;  %v246_v4 = vld [vmem:[#allocation5 + $0x18] sm:$0xff]   ;;  %v247_v5 = vld [vmem:[#allocation5 + $0x20] sm:$0xff]   ;;  %s329_s22 = smov [#allocation7]  }
  0x28   :  { %217 = vmatpush3.bf16.msra.mxu0 %v243_v1  ;;  %v48_v6 = vld [vmem:[#allocation2] sm:$0xff]  ;;  %v248_v9 = vld [vmem:[#allocation5 + $0x28] sm:$0xff]   ;;  %v249_v12 = vld [vmem:[#allocation5 + $0x30] sm:$0xff]   ;;  %s186_s23 = sshll.u32 %s329_s22, 4  ;;  %s187_s23 = int_to_ptr.vmem [resolvable:$true] %s186_s23 }
  0x29   :  { %218 = vmatprep.subr.bf16.mxu0 %v327_v0  ;;  %v196_v7 = vld [vmem:[%s413_s1] ss:$0 sm:$0xff]  ;;  %p300_p3 = scmp.lt.s32.totalorder %s187_s23, %s187_s23 }
  0x2a   :  { %v56_v8 = vmul.f32 %v196_v7, %v48_v6  ;;  %v197_v10 = vld [vmem:[%s414_s2] ss:$0 sm:$0xff]  ;;  %s295_s2 = scalar_lea.vmem %s187_s23, 128 }
  0x2b   :  { %v250_v14 = vld [vmem:[#allocation5 + $0x38] sm:$0xff]   ;;  %p296_p2 = scmp.ne.s32.totalorder %s187_s23, %s295_s2  ;;  %p301_p4 = scmp.lt.s32.totalorder %s295_s2, %s295_s2 }
  0x2c   :  { %219 = vmatpush3.bf16.msra.mxu0 %v244_v2  ;;  %v64_v11 = vadd.f32 %v197_v10, %v56_v8  ;;  %v198_v16 = vld [vmem:[%s416_s4] ss:$0 sm:$0xff] }
  0x2d   :  { %220 = vmatprep.subr.bf16.mxu0 %v327_v0  ;;  %p302_p5 = por %p301_p4, %p300_p3 }
  0x2e   :  { %v65_v13 = vmax.f32 %v64_v11, 0.0 }
  0x2f   :  { %p303_p6 = pnand %p302_p5, %p296_p2 }
  0x30   :  { %221 = vmatpush3.bf16.msra.mxu0 %v245_v3  ;;  %v66_v15 = vpack.c.bf16 %v65_v13, %v65_v13 }
  0x31   :  { %222 = vmatprep.subr.bf16.mxu0 %v327_v0 }
  0x34   :  { %223 = vmatpush3.bf16.msra.mxu0 %v246_v4 }
  0x35   :  { %224 = vmatprep.subr.bf16.mxu0 %v327_v0 }
  0x38   :  { %225 = vmatpush3.bf16.msra.mxu0 %v247_v5 }
  0x39   :  { %226 = vmatprep.subr.bf16.mxu0 %v327_v0 }
  0x3c   :  { %227 = vmatpush3.bf16.msra.mxu0 %v248_v9 }
  0x3d   :  { %228 = vmatprep.subr.bf16.mxu0 %v327_v0 }
  0x40   :  { %229 = vmatpush3.bf16.msra.mxu0 %v249_v12 }
  0x41   :  { %230 = vmatprep.subr.bf16.mxu0 %v327_v0 }
  0x44   :  { %231 = vmatpush3.bf16.msra.mxu0 %v250_v14 }
  0x47   :  { %233 = vmatmul.mubr.bf16.vlgmr.msra.gmra.mrb[0].mxu0 %v66_v15 }
 0x11a   :  { %v172_v17 = vpop.f32.mrb[0].mxu0 }
 0x11b   :  { %v173_v18 = vadd.f32 %v198_v16, %v172_v17  ;;  %v234_v19 = vpop.f32.mrb[1].mxu0 }
 0x11c   :  { %v175_v20 = vpop.f32.mrb[2].mxu0 }
 0x11d   :  { %v178_v21 = vmax.f32 %v173_v18, 0.0  ;;  %v235_v22 = vpop.f32.mrb[3].mxu0 }
 0x11f   :  { %179 = vst [vmem:[#allocation7] sm:$0xff] %v178_v21 }
 0x120   :  { %306 = shalt.err (!%p303_p6)
}
 0x121   :  { %s307_s4 = scalar_lea.hbm %s417_s5, 128 }
 0x122   :  { %p308_p7 = scmp.ne.s32.totalorder %s417_s5, %s307_s4  ;;  %p311_p8 = scmp.lt.u32.totalorder %s307_s4, %s417_s5 }
 0x124   :  { %p313_p9 = pnand %p311_p8, %p308_p7 }
 0x126   :  { %316 = shalt.err (!%p313_p9)
}
 0x127   :  { %189 = dma.vmem_to_hbm [thread:$0]  %s187_s23, 128, %s417_s5, [#allocation4]  }
 0x128   :  { %321 = dma.done.wait [#allocation4], 128  }
 0x129   :  { %322 = vsyncadd [#allocation4], 4294967168 }
 0x12a   :  { %193 = vsyncpa [#allocation3], 1 }
 0x12b   :  { %194 = vsyncpa [#allocation6], 1 }
 0x12c   :  { %195 = vsyncpa [#allocation4], 1 }

</bundles_post_ra>
